<compile_context>
chip_gen: v5e
topology: v5e:2x2
jax: 0.10.0
libtpu: 0.0.40
codegen_flags: <defaults>
</compile_context>

<pallas_src>
import functools

import numpy as np
import jax
import jax.numpy as jnp
from jax import lax
from jax.experimental import pallas as pl
from jax.experimental.pallas import tpu as pltpu

# ------------------------- module hyper-parameters -------------------------
ADC_IN_NC = 4          # adaptive conv input channels  (must equal C of x)
ADC_OUT_NC = 4         # adaptive conv output channels
ADC_KERS = 3           # adaptive conv kernel size
FC_SIZE = 32           # fc_in feature size
FMN_NC = (64, 64)      # hidden widths of the FMN 1x1-conv stack
GROUP_FC = 4           # groups of the last FMN conv
BIAS = True
CNN_PARA_SIZE = ADC_IN_NC * ADC_OUT_NC * ADC_KERS * ADC_KERS + ADC_OUT_NC  # 148

# kernel-internal packed layouts
TAPS = ADC_IN_NC * ADC_KERS * ADC_KERS     # 36 densely packed im2col rows / sample
BIAS_POS = TAPS                            # 36: bias sits right after the taps
TPAD = 40                                  # per-sample patch rows (padded to 8)
WBLK = 128                                 # lane-aligned per-out-channel block in FMN out
PARA_PAD = ADC_OUT_NC * WBLK               # padded FMN layer-3 width (512)


def _fmn_col_scatter():
    """New (blocked/padded) column index for every original FMN output column.

    Original columns: weight (o, c, kh, kw) at o*36 + c*9 + kh*3 + kw, then the
    OUT biases.  New layout: per out-channel o a 128-wide lane block; tap
    (kh, kw, c) sits at lane (kh*K + kw)*IN + c (dense, matching the im2col
    patch-row order built in the kernel), the bias at lane 36, the rest zero.
    """
    K, IN, OUT = ADC_KERS, ADC_IN_NC, ADC_OUT_NC
    cols = np.zeros(CNN_PARA_SIZE, dtype=np.int32)
    for o in range(OUT):
        for c in range(IN):
            for kh in range(K):
                for kw in range(K):
                    cols[o * IN * K * K + c * K * K + kh * K + kw] = (
                        o * WBLK + (kh * K + kw) * IN + c)
        cols[OUT * IN * K * K + o] = o * WBLK + BIAS_POS
    return cols


_NEW_COLS = _fmn_col_scatter()


# ------------------------------ fused kernel --------------------------------
def adap_cnn_fused_kernel(x_ref, fc_ref, w1t_ref, b1_ref, w2t_ref, b2_ref,
                          w3t_ref, b3_ref, *refs,
                          B, C, K, OUT, IMG_W, HW, emit_wb):
    if emit_wb:
        y_ref, wb_ref, p_ref, wlhs_ref = refs
    else:
        y_ref, p_ref, wlhs_ref = refs
    f32 = jnp.float32

    # ---- FMN: three 1x1 Conv1d on a length-1 sequence == dense matmul chain ----
    h = fc_ref[...]                                                    # (B, FC)
    h = jnp.maximum(jnp.dot(h, w1t_ref[...], preferred_element_type=f32)
                    + b1_ref[...], 0.0)
    h = jnp.maximum(jnp.dot(h, w2t_ref[...], preferred_element_type=f32)
                    + b2_ref[...], 0.0)
    wb = jnp.maximum(jnp.dot(h, w3t_ref[...], preferred_element_type=f32)
                     + b3_ref[...], 0.0)                               # (B, PARA_PAD)
    if emit_wb:
        wb_ref[...] = wb.astype(wb_ref.dtype)

    # ---- densely packed im2col patch matrix: TPAD rows per sample. ----
    # Row (kh*K + kw)*C + c of sample block b holds x[b, c] rolled left by
    # kh*W + kw (XLU work); row 36 is the bias ones-row, rows 37..39 are zero.
    for b in range(B):
        xb = x_ref[b]                                                  # (C, HW)
        base = b * TPAD
        for kh in range(K):
            for kw in range(K):
                s = kh * K + kw
                sh = kh * IMG_W + kw
                rolled = xb if sh == 0 else pltpu.roll(xb, shift=HW - sh, axis=1)
                p_ref[base + s * C: base + s * C + C, :] = rolled
        p_ref[base + TAPS: base + TAPS + 1, :] = jnp.ones((1, HW), f32)
        p_ref[base + TAPS + 1: base + TPAD, :] = (
            jnp.zeros((TPAD - TAPS - 1, HW), f32))

    # ---- block-diagonal LHS: row b*OUT + o holds sample-b / out-channel-o
    # taps (+ bias) at lanes [b*TPAD, b*TPAD + TPAD); everything else zero. ----
    wlhs_ref[...] = jnp.zeros_like(wlhs_ref)
    for b in range(B):
        for o in range(OUT):
            wlhs_ref[b * OUT + o: b * OUT + o + 1, b * TPAD: (b + 1) * TPAD] = (
                wb[b: b + 1, o * WBLK: o * WBLK + TPAD])

    # ---- adaptive per-sample conv: ONE MXU matmul, one unmasked (8, HW) store ----
    y_ref[...] = jnp.dot(wlhs_ref[...], p_ref[...],
                         preferred_element_type=f32).astype(y_ref.dtype)


# --------------------------- parameter preparation ---------------------------
def prepare_params(params):
    """One-time preprocessing of the FMN parameters into kernel layouts
    (hoisted out of the per-call forward path)."""
    w1, b1, w2, b2, w3_full, b3 = params
    ncols = jnp.asarray(_NEW_COLS)
    w3t_pad = jnp.zeros((w3_full.shape[1], PARA_PAD), jnp.float32
                        ).at[:, ncols].set(jnp.asarray(w3_full, jnp.float32).T)
    b3_pad = jnp.zeros((1, PARA_PAD), jnp.float32
                       ).at[0, ncols].set(jnp.asarray(b3, jnp.float32))
    return (jnp.asarray(w1, jnp.float32).T,
            jnp.asarray(b1, jnp.float32).reshape(1, -1),
            jnp.asarray(w2, jnp.float32).T,
            jnp.asarray(b2, jnp.float32).reshape(1, -1),
            w3t_pad, b3_pad)


# --------------------------- full block forward -----------------------------
def adap_cnn_block_forward(x, fc_in, splits, prepped, return_weight=False):
    w1t, b1r, w2t, b2r, w3t_pad, b3_pad = prepped
    B, C, H, W = x.shape
    K, OUT, IN = ADC_KERS, ADC_OUT_NC, ADC_IN_NC
    assert C == IN
    Ho, Wo = H - K + 1, W - K + 1
    HW = H * W

    # lane-dense flattened input (B, C, H*W); no shift padding needed (the
    # valid conv window never reads past HW-1; wrapped taps only affect
    # discarded output positions).
    x_flat = x.reshape(B, C, HW).astype(jnp.float32)

    vmem = pl.BlockSpec(memory_space=pltpu.MemorySpace.VMEM)
    kern = functools.partial(adap_cnn_fused_kernel, B=B, C=C, K=K, OUT=OUT,
                             IMG_W=W, HW=HW, emit_wb=return_weight)
    if return_weight:
        out_shape = (jax.ShapeDtypeStruct((B * OUT, HW), jnp.float32),
                     jax.ShapeDtypeStruct((B, PARA_PAD), jnp.float32))
        out_specs = (vmem, vmem)
    else:
        out_shape = jax.ShapeDtypeStruct((B * OUT, HW), jnp.float32)
        out_specs = vmem

    res = pl.pallas_call(
        kern,
        out_shape=out_shape,
        in_specs=[vmem] * 8,
        out_specs=out_specs,
        scratch_shapes=[pltpu.VMEM((B * TPAD, HW), jnp.float32),
                        pltpu.VMEM((B * OUT, B * TPAD), jnp.float32)],
    )(x_flat, fc_in, w1t, b1r, w2t, b2r, w3t_pad, b3_pad)

    y_flat = res[0] if return_weight else res
    # valid window + F.conv3d output layout (1, B*OUT, 1, Ho, Wo); positions
    # outside the valid window wrap across image rows and are discarded here.
    y = y_flat.reshape(B, OUT, H, W)[:, :, :Ho, :Wo].reshape(1, B * OUT, 1, Ho, Wo)
    if return_weight:
        wb = res[1]
        weight = wb[:, jnp.asarray(_NEW_COLS[:OUT * IN * K * K])]   # original order
        weight = weight.reshape(splits, -1, IN, 1, K, K).reshape(-1, IN, 1, K, K)
        return y, weight
    return y


# ------------------------------ pure-JAX reference ---------------------------
def reference_forward(x, fc_in, splits, params):
    w1, b1, w2, b2, w3_full, b3 = params
    hp = lax.Precision.HIGHEST
    h = jnp.maximum(jnp.dot(fc_in, w1.T, precision=hp) + b1, 0.0)
    h = jnp.maximum(jnp.dot(h, w2.T, precision=hp) + b2, 0.0)
    h = jnp.maximum(jnp.dot(h, w3_full.T, precision=hp) + b3, 0.0)
    OUT, IN, K = ADC_OUT_NC, ADC_IN_NC, ADC_KERS
    weight = h[:, :-OUT].reshape(splits, -1, IN, 1, K, K).reshape(-1, IN, 1, K, K)
    bias = h[:, -OUT:].reshape(-1)
    B, C, H, W = x.shape
    inp = x.reshape(1, B * C, 1, H, W)
    y = lax.conv_general_dilated(
        inp, weight, window_strides=(1, 1, 1), padding="VALID",
        dimension_numbers=("NCDHW", "OIDHW", "NCDHW"),
        feature_group_count=B, precision=hp)
    return y + bias.reshape(1, -1, 1, 1, 1)


# ------------------------------------ main -----------------------------------
if __name__ == "__main__":
    key = jax.random.PRNGKey(0)
    ks = jax.random.split(key, 8)
    B = splits = 2
    H = W = 16

    x = jax.random.normal(ks[0], (B, ADC_IN_NC, H, W), jnp.float32)
    fc_in = jax.random.normal(ks[1], (B, FC_SIZE), jnp.float32)

    s = 0.1
    w1 = s * jax.random.normal(ks[2], (FMN_NC[0], FC_SIZE), jnp.float32)
    b1 = s * jax.random.normal(ks[3], (FMN_NC[0],), jnp.float32)
    w2 = s * jax.random.normal(ks[4], (FMN_NC[1], FMN_NC[0]), jnp.float32)
    b2 = s * jax.random.normal(ks[5], (FMN_NC[1],), jnp.float32)
    # grouped 1x1 Conv1d weight (cnn_para_size, FMN_NC[1]//G, 1) -> block-diagonal dense
    in_pg = FMN_NC[1] // GROUP_FC
    out_pg = CNN_PARA_SIZE // GROUP_FC
    w3_grouped = s * jax.random.normal(ks[6], (CNN_PARA_SIZE, in_pg), jnp.float32)
    b3 = s * jax.random.normal(ks[7], (CNN_PARA_SIZE,), jnp.float32)
    w3_full = jnp.zeros((CNN_PARA_SIZE, FMN_NC[1]), jnp.float32)
    for g in range(GROUP_FC):
        w3_full = w3_full.at[g * out_pg:(g + 1) * out_pg,
                             g * in_pg:(g + 1) * in_pg].set(
            w3_grouped[g * out_pg:(g + 1) * out_pg])
    params = (w1, b1, w2, b2, w3_full, b3)

    # one-time parameter prep (hoisted out of the per-call forward)
    prepped = prepare_params(params)

    fwd = jax.jit(adap_cnn_block_forward, static_argnums=2)
    y = jax.block_until_ready(fwd(x, fc_in, splits, prepped))

    y_ref = reference_forward(x, fc_in, splits, params)
    Ho, Wo = H - ADC_KERS + 1, W - ADC_KERS + 1
    assert y.shape == (1, B * ADC_OUT_NC, 1, Ho, Wo), y.shape
    assert jnp.allclose(y, y_ref, atol=5e-2, rtol=5e-2), float(jnp.max(jnp.abs(y - y_ref)))
    print("KERNEL_OK")
</pallas_src>

<mosaic_0001>
module attributes {stable_mosaic.version = 11 : i64} {
  func.func @adap_cnn_fused_kernel(%arg0: memref<2x4x256xf32, #tpu.memory_space<vmem>>, %arg1: memref<2x32xf32, #tpu.memory_space<vmem>>, %arg2: memref<32x64xf32, #tpu.memory_space<vmem>>, %arg3: memref<1x64xf32, #tpu.memory_space<vmem>>, %arg4: memref<64x64xf32, #tpu.memory_space<vmem>>, %arg5: memref<1x64xf32, #tpu.memory_space<vmem>>, %arg6: memref<64x512xf32, #tpu.memory_space<vmem>>, %arg7: memref<1x512xf32, #tpu.memory_space<vmem>>, %arg8: memref<8x256xf32, #tpu.memory_space<vmem>>, %arg9: memref<80x256xf32, #tpu.memory_space<vmem>>, %arg10: memref<8x80xf32, #tpu.memory_space<vmem>>) attributes {dimension_semantics = [], scalar_prefetch = 0 : i64, scratch_operands = 2 : i64, tpu.core_type = #tpu.core_type<tc>} {
    %c0 = arith.constant 0 : index
    %c0_0 = arith.constant 0 : index
    %0 = vector.load %arg1[%c0, %c0_0] : memref<2x32xf32, #tpu.memory_space<vmem>>, vector<2x32xf32>
    %c0_1 = arith.constant 0 : index
    %c0_2 = arith.constant 0 : index
    %1 = vector.load %arg2[%c0_1, %c0_2] : memref<32x64xf32, #tpu.memory_space<vmem>>, vector<32x64xf32>
    %cst = arith.constant dense<0.000000e+00> : vector<2x64xf32>
    %2 = tpu.matmul %0, %1, %cst {dimension_numbers = #tpu.dot_dimension_numbers<[1], [0], [0], [1], [0, 0, 1, 1], [], []>} : vector<2x32xf32>, vector<32x64xf32>, vector<2x64xf32> -> vector<2x64xf32>
    %c0_3 = arith.constant 0 : index
    %c0_4 = arith.constant 0 : index
    %3 = vector.load %arg3[%c0_3, %c0_4] : memref<1x64xf32, #tpu.memory_space<vmem>>, vector<1x64xf32>
    %4 = vector.broadcast %3 : vector<1x64xf32> to vector<2x64xf32>
    %5 = arith.addf %2, %4 : vector<2x64xf32>
    %cst_5 = arith.constant 0.000000e+00 : f32
    %6 = vector.broadcast %cst_5 : f32 to vector<2x64xf32>
    %7 = arith.maximumf %5, %6 : vector<2x64xf32>
    %c0_6 = arith.constant 0 : index
    %c0_7 = arith.constant 0 : index
    %8 = vector.load %arg4[%c0_6, %c0_7] : memref<64x64xf32, #tpu.memory_space<vmem>>, vector<64x64xf32>
    %cst_8 = arith.constant dense<0.000000e+00> : vector<2x64xf32>
    %9 = tpu.matmul %7, %8, %cst_8 {dimension_numbers = #tpu.dot_dimension_numbers<[1], [0], [0], [1], [0, 0, 1, 1], [], []>} : vector<2x64xf32>, vector<64x64xf32>, vector<2x64xf32> -> vector<2x64xf32>
    %c0_9 = arith.constant 0 : index
    %c0_10 = arith.constant 0 : index
    %10 = vector.load %arg5[%c0_9, %c0_10] : memref<1x64xf32, #tpu.memory_space<vmem>>, vector<1x64xf32>
    %11 = vector.broadcast %10 : vector<1x64xf32> to vector<2x64xf32>
    %12 = arith.addf %9, %11 : vector<2x64xf32>
    %cst_11 = arith.constant 0.000000e+00 : f32
    %13 = vector.broadcast %cst_11 : f32 to vector<2x64xf32>
    %14 = arith.maximumf %12, %13 : vector<2x64xf32>
    %c0_12 = arith.constant 0 : index
    %c0_13 = arith.constant 0 : index
    %15 = vector.load %arg6[%c0_12, %c0_13] : memref<64x512xf32, #tpu.memory_space<vmem>>, vector<64x512xf32>
    %cst_14 = arith.constant dense<0.000000e+00> : vector<2x512xf32>
    %16 = tpu.matmul %14, %15, %cst_14 {dimension_numbers = #tpu.dot_dimension_numbers<[1], [0], [0], [1], [0, 0, 1, 1], [], []>} : vector<2x64xf32>, vector<64x512xf32>, vector<2x512xf32> -> vector<2x512xf32>
    %c0_15 = arith.constant 0 : index
    %c0_16 = arith.constant 0 : index
    %17 = vector.load %arg7[%c0_15, %c0_16] : memref<1x512xf32, #tpu.memory_space<vmem>>, vector<1x512xf32>
    %18 = vector.broadcast %17 : vector<1x512xf32> to vector<2x512xf32>
    %19 = arith.addf %16, %18 : vector<2x512xf32>
    %cst_17 = arith.constant 0.000000e+00 : f32
    %20 = vector.broadcast %cst_17 : f32 to vector<2x512xf32>
    %21 = arith.maximumf %19, %20 : vector<2x512xf32>
    %c0_18 = arith.constant 0 : index
    %c0_19 = arith.constant 0 : index
    %c0_20 = arith.constant 0 : index
    %22 = vector.load %arg0[%c0_18, %c0_19, %c0_20] : memref<2x4x256xf32, #tpu.memory_space<vmem>>, vector<1x4x256xf32>
    %23 = vector.shape_cast %22 : vector<1x4x256xf32> to vector<4x256xf32>
    %c0_21 = arith.constant 0 : index
    %c0_22 = arith.constant 0 : index
    %24 = vector.load %arg9[%c0_21, %c0_22] : memref<80x256xf32, #tpu.memory_space<vmem>>, vector<4x256xf32>
    tpu.vector_store %arg9[%c0_21, %c0_22], %23 {strides = array<i32>} : memref<80x256xf32, #tpu.memory_space<vmem>>, vector<4x256xf32>,
    %c255_i32 = arith.constant 255 : i32
    %25 = tpu.dynamic_rotate %23 by %c255_i32 dim 1 : vector<4x256xf32>, i32 -> vector<4x256xf32>
    %c4 = arith.constant 4 : index
    %c0_23 = arith.constant 0 : index
    %26 = vector.load %arg9[%c4, %c0_23] : memref<80x256xf32, #tpu.memory_space<vmem>>, vector<4x256xf32>
    tpu.vector_store %arg9[%c4, %c0_23], %25 {strides = array<i32>} : memref<80x256xf32, #tpu.memory_space<vmem>>, vector<4x256xf32>,
    %c254_i32 = arith.constant 254 : i32
    %27 = tpu.dynamic_rotate %23 by %c254_i32 dim 1 : vector<4x256xf32>, i32 -> vector<4x256xf32>
    %c8 = arith.constant 8 : index
    %c0_24 = arith.constant 0 : index
    %28 = vector.load %arg9[%c8, %c0_24] : memref<80x256xf32, #tpu.memory_space<vmem>>, vector<4x256xf32>
    tpu.vector_store %arg9[%c8, %c0_24], %27 {strides = array<i32>} : memref<80x256xf32, #tpu.memory_space<vmem>>, vector<4x256xf32>,
    %c240_i32 = arith.constant 240 : i32
    %29 = tpu.dynamic_rotate %23 by %c240_i32 dim 1 : vector<4x256xf32>, i32 -> vector<4x256xf32>
    %c12 = arith.constant 12 : index
    %c0_25 = arith.constant 0 : index
    %30 = vector.load %arg9[%c12, %c0_25] : memref<80x256xf32, #tpu.memory_space<vmem>>, vector<4x256xf32>
    tpu.vector_store %arg9[%c12, %c0_25], %29 {strides = array<i32>} : memref<80x256xf32, #tpu.memory_space<vmem>>, vector<4x256xf32>,
    %c239_i32 = arith.constant 239 : i32
    %31 = tpu.dynamic_rotate %23 by %c239_i32 dim 1 : vector<4x256xf32>, i32 -> vector<4x256xf32>
    %c16 = arith.constant 16 : index
    %c0_26 = arith.constant 0 : index
    %32 = vector.load %arg9[%c16, %c0_26] : memref<80x256xf32, #tpu.memory_space<vmem>>, vector<4x256xf32>
    tpu.vector_store %arg9[%c16, %c0_26], %31 {strides = array<i32>} : memref<80x256xf32, #tpu.memory_space<vmem>>, vector<4x256xf32>,
    %c238_i32 = arith.constant 238 : i32
    %33 = tpu.dynamic_rotate %23 by %c238_i32 dim 1 : vector<4x256xf32>, i32 -> vector<4x256xf32>
    %c20 = arith.constant 20 : index
    %c0_27 = arith.constant 0 : index
    %34 = vector.load %arg9[%c20, %c0_27] : memref<80x256xf32, #tpu.memory_space<vmem>>, vector<4x256xf32>
    tpu.vector_store %arg9[%c20, %c0_27], %33 {strides = array<i32>} : memref<80x256xf32, #tpu.memory_space<vmem>>, vector<4x256xf32>,
    %c224_i32 = arith.constant 224 : i32
    %35 = tpu.dynamic_rotate %23 by %c224_i32 dim 1 : vector<4x256xf32>, i32 -> vector<4x256xf32>
    %c24 = arith.constant 24 : index
    %c0_28 = arith.constant 0 : index
    %36 = vector.load %arg9[%c24, %c0_28] : memref<80x256xf32, #tpu.memory_space<vmem>>, vector<4x256xf32>
    tpu.vector_store %arg9[%c24, %c0_28], %35 {strides = array<i32>} : memref<80x256xf32, #tpu.memory_space<vmem>>, vector<4x256xf32>,
    %c223_i32 = arith.constant 223 : i32
    %37 = tpu.dynamic_rotate %23 by %c223_i32 dim 1 : vector<4x256xf32>, i32 -> vector<4x256xf32>
    %c28 = arith.constant 28 : index
    %c0_29 = arith.constant 0 : index
    %38 = vector.load %arg9[%c28, %c0_29] : memref<80x256xf32, #tpu.memory_space<vmem>>, vector<4x256xf32>
    tpu.vector_store %arg9[%c28, %c0_29], %37 {strides = array<i32>} : memref<80x256xf32, #tpu.memory_space<vmem>>, vector<4x256xf32>,
    %c222_i32 = arith.constant 222 : i32
    %39 = tpu.dynamic_rotate %23 by %c222_i32 dim 1 : vector<4x256xf32>, i32 -> vector<4x256xf32>
    %c32 = arith.constant 32 : index
    %c0_30 = arith.constant 0 : index
    %40 = vector.load %arg9[%c32, %c0_30] : memref<80x256xf32, #tpu.memory_space<vmem>>, vector<4x256xf32>
    tpu.vector_store %arg9[%c32, %c0_30], %39 {strides = array<i32>} : memref<80x256xf32, #tpu.memory_space<vmem>>, vector<4x256xf32>,
    %cst_31 = arith.constant 1.000000e+00 : f32
    %41 = vector.broadcast %cst_31 : f32 to vector<1x256xf32>
    %c36 = arith.constant 36 : index
    %c0_32 = arith.constant 0 : index
    %42 = vector.load %arg9[%c36, %c0_32] : memref<80x256xf32, #tpu.memory_space<vmem>>, vector<1x256xf32>
    tpu.vector_store %arg9[%c36, %c0_32], %41 {strides = array<i32>} : memref<80x256xf32, #tpu.memory_space<vmem>>, vector<1x256xf32>,
    %cst_33 = arith.constant 0.000000e+00 : f32
    %43 = vector.broadcast %cst_33 : f32 to vector<3x256xf32>
    %c37 = arith.constant 37 : index
    %c0_34 = arith.constant 0 : index
    %44 = vector.load %arg9[%c37, %c0_34] : memref<80x256xf32, #tpu.memory_space<vmem>>, vector<3x256xf32>
    tpu.vector_store %arg9[%c37, %c0_34], %43 {strides = array<i32>} : memref<80x256xf32, #tpu.memory_space<vmem>>, vector<3x256xf32>,
    %c1 = arith.constant 1 : index
    %c0_35 = arith.constant 0 : index
    %c0_36 = arith.constant 0 : index
    %45 = vector.load %arg0[%c1, %c0_35, %c0_36] : memref<2x4x256xf32, #tpu.memory_space<vmem>>, vector<1x4x256xf32>
    %46 = vector.shape_cast %45 : vector<1x4x256xf32> to vector<4x256xf32>
    %c40 = arith.constant 40 : index
    %c0_37 = arith.constant 0 : index
    %47 = vector.load %arg9[%c40, %c0_37] : memref<80x256xf32, #tpu.memory_space<vmem>>, vector<4x256xf32>
    tpu.vector_store %arg9[%c40, %c0_37], %46 {strides = array<i32>} : memref<80x256xf32, #tpu.memory_space<vmem>>, vector<4x256xf32>,
    %c255_i32_38 = arith.constant 255 : i32
    %48 = tpu.dynamic_rotate %46 by %c255_i32_38 dim 1 : vector<4x256xf32>, i32 -> vector<4x256xf32>
    %c44 = arith.constant 44 : index
    %c0_39 = arith.constant 0 : index
    %49 = vector.load %arg9[%c44, %c0_39] : memref<80x256xf32, #tpu.memory_space<vmem>>, vector<4x256xf32>
    tpu.vector_store %arg9[%c44, %c0_39], %48 {strides = array<i32>} : memref<80x256xf32, #tpu.memory_space<vmem>>, vector<4x256xf32>,
    %c254_i32_40 = arith.constant 254 : i32
    %50 = tpu.dynamic_rotate %46 by %c254_i32_40 dim 1 : vector<4x256xf32>, i32 -> vector<4x256xf32>
    %c48 = arith.constant 48 : index
    %c0_41 = arith.constant 0 : index
    %51 = vector.load %arg9[%c48, %c0_41] : memref<80x256xf32, #tpu.memory_space<vmem>>, vector<4x256xf32>
    tpu.vector_store %arg9[%c48, %c0_41], %50 {strides = array<i32>} : memref<80x256xf32, #tpu.memory_space<vmem>>, vector<4x256xf32>,
    %c240_i32_42 = arith.constant 240 : i32
    %52 = tpu.dynamic_rotate %46 by %c240_i32_42 dim 1 : vector<4x256xf32>, i32 -> vector<4x256xf32>
    %c52 = arith.constant 52 : index
    %c0_43 = arith.constant 0 : index
    %53 = vector.load %arg9[%c52, %c0_43] : memref<80x256xf32, #tpu.memory_space<vmem>>, vector<4x256xf32>
    tpu.vector_store %arg9[%c52, %c0_43], %52 {strides = array<i32>} : memref<80x256xf32, #tpu.memory_space<vmem>>, vector<4x256xf32>,
    %c239_i32_44 = arith.constant 239 : i32
    %54 = tpu.dynamic_rotate %46 by %c239_i32_44 dim 1 : vector<4x256xf32>, i32 -> vector<4x256xf32>
    %c56 = arith.constant 56 : index
    %c0_45 = arith.constant 0 : index
    %55 = vector.load %arg9[%c56, %c0_45] : memref<80x256xf32, #tpu.memory_space<vmem>>, vector<4x256xf32>
    tpu.vector_store %arg9[%c56, %c0_45], %54 {strides = array<i32>} : memref<80x256xf32, #tpu.memory_space<vmem>>, vector<4x256xf32>,
    %c238_i32_46 = arith.constant 238 : i32
    %56 = tpu.dynamic_rotate %46 by %c238_i32_46 dim 1 : vector<4x256xf32>, i32 -> vector<4x256xf32>
    %c60 = arith.constant 60 : index
    %c0_47 = arith.constant 0 : index
    %57 = vector.load %arg9[%c60, %c0_47] : memref<80x256xf32, #tpu.memory_space<vmem>>, vector<4x256xf32>
    tpu.vector_store %arg9[%c60, %c0_47], %56 {strides = array<i32>} : memref<80x256xf32, #tpu.memory_space<vmem>>, vector<4x256xf32>,
    %c224_i32_48 = arith.constant 224 : i32
    %58 = tpu.dynamic_rotate %46 by %c224_i32_48 dim 1 : vector<4x256xf32>, i32 -> vector<4x256xf32>
    %c64 = arith.constant 64 : index
    %c0_49 = arith.constant 0 : index
    %59 = vector.load %arg9[%c64, %c0_49] : memref<80x256xf32, #tpu.memory_space<vmem>>, vector<4x256xf32>
    tpu.vector_store %arg9[%c64, %c0_49], %58 {strides = array<i32>} : memref<80x256xf32, #tpu.memory_space<vmem>>, vector<4x256xf32>,
    %c223_i32_50 = arith.constant 223 : i32
    %60 = tpu.dynamic_rotate %46 by %c223_i32_50 dim 1 : vector<4x256xf32>, i32 -> vector<4x256xf32>
    %c68 = arith.constant 68 : index
    %c0_51 = arith.constant 0 : index
    %61 = vector.load %arg9[%c68, %c0_51] : memref<80x256xf32, #tpu.memory_space<vmem>>, vector<4x256xf32>
    tpu.vector_store %arg9[%c68, %c0_51], %60 {strides = array<i32>} : memref<80x256xf32, #tpu.memory_space<vmem>>, vector<4x256xf32>,
    %c222_i32_52 = arith.constant 222 : i32
    %62 = tpu.dynamic_rotate %46 by %c222_i32_52 dim 1 : vector<4x256xf32>, i32 -> vector<4x256xf32>
    %c72 = arith.constant 72 : index
    %c0_53 = arith.constant 0 : index
    %63 = vector.load %arg9[%c72, %c0_53] : memref<80x256xf32, #tpu.memory_space<vmem>>, vector<4x256xf32>
    tpu.vector_store %arg9[%c72, %c0_53], %62 {strides = array<i32>} : memref<80x256xf32, #tpu.memory_space<vmem>>, vector<4x256xf32>,
    %cst_54 = arith.constant 1.000000e+00 : f32
    %64 = vector.broadcast %cst_54 : f32 to vector<1x256xf32>
    %c76 = arith.constant 76 : index
    %c0_55 = arith.constant 0 : index
    %65 = vector.load %arg9[%c76, %c0_55] : memref<80x256xf32, #tpu.memory_space<vmem>>, vector<1x256xf32>
    tpu.vector_store %arg9[%c76, %c0_55], %64 {strides = array<i32>} : memref<80x256xf32, #tpu.memory_space<vmem>>, vector<1x256xf32>,
    %cst_56 = arith.constant 0.000000e+00 : f32
    %66 = vector.broadcast %cst_56 : f32 to vector<3x256xf32>
    %c77 = arith.constant 77 : index
    %c0_57 = arith.constant 0 : index
    %67 = vector.load %arg9[%c77, %c0_57] : memref<80x256xf32, #tpu.memory_space<vmem>>, vector<3x256xf32>
    tpu.vector_store %arg9[%c77, %c0_57], %66 {strides = array<i32>} : memref<80x256xf32, #tpu.memory_space<vmem>>, vector<3x256xf32>,
    %cst_58 = arith.constant 0.000000e+00 : f32
    %68 = vector.broadcast %cst_58 : f32 to vector<8x80xf32>
    %c0_59 = arith.constant 0 : index
    %c0_60 = arith.constant 0 : index
    %69 = vector.load %arg10[%c0_59, %c0_60] : memref<8x80xf32, #tpu.memory_space<vmem>>, vector<8x80xf32>
    tpu.vector_store %arg10[%c0_59, %c0_60], %68 {strides = array<i32>} : memref<8x80xf32, #tpu.memory_space<vmem>>, vector<8x80xf32>,
    %70 = vector.extract_strided_slice %21 {offsets = [0, 0], sizes = [1, 40], strides = [1, 1]} : vector<2x512xf32> to vector<1x40xf32>
    %c0_61 = arith.constant 0 : index
    %c0_62 = arith.constant 0 : index
    %71 = vector.load %arg10[%c0_61, %c0_62] : memref<8x80xf32, #tpu.memory_space<vmem>>, vector<1x40xf32>
    tpu.vector_store %arg10[%c0_61, %c0_62], %70 {strides = array<i32>} : memref<8x80xf32, #tpu.memory_space<vmem>>, vector<1x40xf32>,
    %72 = vector.extract_strided_slice %21 {offsets = [0, 128], sizes = [1, 40], strides = [1, 1]} : vector<2x512xf32> to vector<1x40xf32>
    %c1_63 = arith.constant 1 : index
    %c0_64 = arith.constant 0 : index
    %73 = vector.load %arg10[%c1_63, %c0_64] : memref<8x80xf32, #tpu.memory_space<vmem>>, vector<1x40xf32>
    tpu.vector_store %arg10[%c1_63, %c0_64], %72 {strides = array<i32>} : memref<8x80xf32, #tpu.memory_space<vmem>>, vector<1x40xf32>,
    %74 = vector.extract_strided_slice %21 {offsets = [0, 256], sizes = [1, 40], strides = [1, 1]} : vector<2x512xf32> to vector<1x40xf32>
    %c2 = arith.constant 2 : index
    %c0_65 = arith.constant 0 : index
    %75 = vector.load %arg10[%c2, %c0_65] : memref<8x80xf32, #tpu.memory_space<vmem>>, vector<1x40xf32>
    tpu.vector_store %arg10[%c2, %c0_65], %74 {strides = array<i32>} : memref<8x80xf32, #tpu.memory_space<vmem>>, vector<1x40xf32>,
    %76 = vector.extract_strided_slice %21 {offsets = [0, 384], sizes = [1, 40], strides = [1, 1]} : vector<2x512xf32> to vector<1x40xf32>
    %c3 = arith.constant 3 : index
    %c0_66 = arith.constant 0 : index
    %77 = vector.load %arg10[%c3, %c0_66] : memref<8x80xf32, #tpu.memory_space<vmem>>, vector<1x40xf32>
    tpu.vector_store %arg10[%c3, %c0_66], %76 {strides = array<i32>} : memref<8x80xf32, #tpu.memory_space<vmem>>, vector<1x40xf32>,
    %78 = vector.extract_strided_slice %21 {offsets = [1, 0], sizes = [1, 40], strides = [1, 1]} : vector<2x512xf32> to vector<1x40xf32>
    %c4_67 = arith.constant 4 : index
    %c40_68 = arith.constant 40 : index
    %79 = vector.load %arg10[%c4_67, %c40_68] : memref<8x80xf32, #tpu.memory_space<vmem>>, vector<1x40xf32>
    tpu.vector_store %arg10[%c4_67, %c40_68], %78 {strides = array<i32>} : memref<8x80xf32, #tpu.memory_space<vmem>>, vector<1x40xf32>,
    %80 = vector.extract_strided_slice %21 {offsets = [1, 128], sizes = [1, 40], strides = [1, 1]} : vector<2x512xf32> to vector<1x40xf32>
    %c5 = arith.constant 5 : index
    %c40_69 = arith.constant 40 : index
    %81 = vector.load %arg10[%c5, %c40_69] : memref<8x80xf32, #tpu.memory_space<vmem>>, vector<1x40xf32>
    tpu.vector_store %arg10[%c5, %c40_69], %80 {strides = array<i32>} : memref<8x80xf32, #tpu.memory_space<vmem>>, vector<1x40xf32>,
    %82 = vector.extract_strided_slice %21 {offsets = [1, 256], sizes = [1, 40], strides = [1, 1]} : vector<2x512xf32> to vector<1x40xf32>
    %c6 = arith.constant 6 : index
    %c40_70 = arith.constant 40 : index
    %83 = vector.load %arg10[%c6, %c40_70] : memref<8x80xf32, #tpu.memory_space<vmem>>, vector<1x40xf32>
    tpu.vector_store %arg10[%c6, %c40_70], %82 {strides = array<i32>} : memref<8x80xf32, #tpu.memory_space<vmem>>, vector<1x40xf32>,
    %84 = vector.extract_strided_slice %21 {offsets = [1, 384], sizes = [1, 40], strides = [1, 1]} : vector<2x512xf32> to vector<1x40xf32>
    %c7 = arith.constant 7 : index
    %c40_71 = arith.constant 40 : index
    %85 = vector.load %arg10[%c7, %c40_71] : memref<8x80xf32, #tpu.memory_space<vmem>>, vector<1x40xf32>
    tpu.vector_store %arg10[%c7, %c40_71], %84 {strides = array<i32>} : memref<8x80xf32, #tpu.memory_space<vmem>>, vector<1x40xf32>,
    %c0_72 = arith.constant 0 : index
    %c0_73 = arith.constant 0 : index
    %86 = vector.load %arg10[%c0_72, %c0_73] : memref<8x80xf32, #tpu.memory_space<vmem>>, vector<8x80xf32>
    %c0_74 = arith.constant 0 : index
    %c0_75 = arith.constant 0 : index
    %87 = vector.load %arg9[%c0_74, %c0_75] : memref<80x256xf32, #tpu.memory_space<vmem>>, vector<80x256xf32>
    %cst_76 = arith.constant dense<0.000000e+00> : vector<8x256xf32>
    %88 = tpu.matmul %86, %87, %cst_76 {dimension_numbers = #tpu.dot_dimension_numbers<[1], [0], [0], [1], [0, 0, 1, 1], [], []>} : vector<8x80xf32>, vector<80x256xf32>, vector<8x256xf32> -> vector<8x256xf32>
    %c0_77 = arith.constant 0 : index
    %c0_78 = arith.constant 0 : index
    %89 = vector.load %arg8[%c0_77, %c0_78] : memref<8x256xf32, #tpu.memory_space<vmem>>, vector<8x256xf32>
    tpu.vector_store %arg8[%c0_77, %c0_78], %88 {strides = array<i32>} : memref<8x256xf32, #tpu.memory_space<vmem>>, vector<8x256xf32>,
    return
  }
}

</mosaic_0001>

<bundles_post_ra>
// kernel: adap_cnn_block_forward.1
= control target key start
LH: loop header
LB: loop body
LE: loop exit
PB: predicated region body
PF: predicated region fallthrough
CT: control target
= control target key end

     0   :  { %13 = vsyncpa [#allocation5], 0  ;;  %s694_s30 = smov [#allocation4]   ;;  %s695_s10 = smov 512   ;;  %s984_s0 = inlined_call_operand.vmem [shape: f32[2,4,256], index: 0, kind: input, shape index: {}]   ;;  %s985_s1 = inlined_call_operand.vmem [shape: f32[2,32], index: 1, kind: input, shape index: {}]   ;;  %s986_s2 = inlined_call_operand.vmem [shape: f32[32,64], index: 2, kind: input, shape index: {}]   ;;  %s987_s3 = inlined_call_operand.vmem [shape: f32[1,64], index: 3, kind: input, shape index: {}]   ;;  %s988_s4 = inlined_call_operand.vmem [shape: f32[64,64], index: 4, kind: input, shape index: {}]   ;;  %s989_s5 = inlined_call_operand.vmem [shape: f32[1,64], index: 5, kind: input, shape index: {}]   ;;  %s990_s6 = inlined_call_operand.hbm [shape: f32[64,512], index: 6, kind: input, shape index: {}]   ;;  %s991_s7 = inlined_call_operand.vmem [shape: f32[1,512], index: 7, kind: input, shape index: {}]   ;;  %s992_s8 = inlined_call_operand.vmem [shape: f32[8,256], index: 8, kind: output, shape index: {}]  }
   0x1   :  { %s30_s29 = sshll.u32 %s990_s6, 4  ;;  %s32_s9 = sshll.u32 %s694_s30, 4  ;;  %s31_s29 = int_to_ptr.hbm [resolvable:$true] %s30_s29  ;;  %s33_s9 = int_to_ptr.vmem [resolvable:$true] %s32_s9 }
   0x2   :  { %s696_s11 = smov 32  }
   0x3   :  { %38 = dma.hbm_to_vmem [thread:$0]  %s31_s29, 4096, %s33_s9, [#allocation5], %s695_s10, %s695_s10, %s696_s11  }
   0x4   :  { %692 = dma.done.wait [#allocation5], 4096  }
   0x5   :  { %693 = vsyncadd [#allocation5], 4294963200  ;;  %v49_v0 = vld [vmem:[%s986_s2 + $0x18] sm:$0xff]  ;;  %v48_v1 = vld [vmem:[%s986_s2 + $0x10] sm:$0xff]  ;;  %vm54_vm0 = vcmask 261120   ;;  %vm91_vm1 = vcmask 523264  }
   0x6   :  { %70 = vmatpush.msra.mxu0 %v49_v0  ;;  %v86_v2 = vld [vmem:[%s988_s4 + $0x38] sm:$0xff]  ;;  %v47_v3 = vld [vmem:[%s986_s2 + $0x8] sm:$0xff]  ;;  %v85_v4 = vld [vmem:[%s988_s4 + $0x30] sm:$0xff]  ;;  %s697_s16 = smov 112   ;;  %s699_s6 = smov 110   ;;  %vm544_vm10 = vcmask 654336  }
   0x7   :  { %103 = vmatpush.msra.mxu1 %v86_v2  ;;  %v84_v5 = vld [vmem:[%s988_s4 + $0x28] sm:$0xff]  ;;  %v46_v6 = vld [vmem:[%s986_s2] sm:$0xff]  ;;  %v82_v9 = vld [vmem:[%s988_s4 + $0x18] sm:$0xff]  ;;  %s700_s17 = smov 96   ;;  %s701_s18 = smov 95   ;;  %vm546_vm12 = vcmask 319488  }
   0x8   :  { %71 = vmatpush.msra.mxu0 %v48_v1  ;;  %v45_v7 = vld [vmem:[%s985_s1] sm:$0x3]  ;;  %v81_v10 = vld [vmem:[%s988_s4 + $0x10] sm:$0xff]  ;;  %v80_v11 = vld [vmem:[%s988_s4 + $0x8] sm:$0xff]  ;;  %s702_s21 = smov 94   ;;  %s703_s22 = smov 127  }
   0x9   :  { %104 = vmatpush.msra.mxu1 %v85_v4  ;;  %v83_v8 = vld [vmem:[%s988_s4 + $0x20] sm:$0xff]  ;;  %v144_v26 = vld [vmem:[#allocation4 + $0xe0] sm:$0xff]  ;;  %v145_v27 = vld [vmem:[#allocation4 + $0xe8] sm:$0xff]  ;;  %vm555_vm13 = vcmask 648513  }
   0xa   :  { %72 = vmatpush.msra.mxu0 %v47_v3  ;;  %v79_v12 = vld [vmem:[%s988_s4] sm:$0xff]  ;;  %169 = vmatpush.msra.mxu2 %v144_v26  ;;  %v147_v29 = vld [vmem:[#allocation4 + $0xf8] sm:$0xff]  ;;  %v140_v32 = vld [vmem:[#allocation4 + $0xc0] sm:$0xff] }
   0xb   :  { %105 = vmatpush.msra.mxu1 %v84_v5  ;;  %v798_v13 = vld [vmem:[%s984_s0] sm:$0xff]  ;;  %189 = vmatpush.msra.mxu3 %v145_v27  ;;  %v141_v33 = vld [vmem:[#allocation4 + $0xc8] sm:$0xff]  ;;  %v143_v35 = vld [vmem:[#allocation4 + $0xd8] sm:$0xff] }
   0xc   :  { %73 = vmatpush.msra.mxu0 %v46_v6  ;;  %247 = vst [vmem:[#allocation1] ss:$2 sm:$0xff] %v798_v13  ;;  %v666_v18 = vld [vmem:[%s987_s3] ss:$0 sm:$0xff]  ;;  %s698_s3 = smov 111   ;;  %170 = vmatpush.msra.mxu2 %v140_v32  ;;  %v136_v36 = vld [vmem:[#allocation4 + $0xa0] sm:$0xff] }
   0xd   :  { %643 = vmatmul.msk.f32.vlgmr.msra.gmra.mxu0 %vm54_vm0, %v45_v7  ;;  %106 = vmatpush.msra.mxu1 %v83_v8  ;;  %v146_v28 = vld [vmem:[#allocation4 + $0xf0] sm:$0xff]  ;;  %v137_v37 = vld [vmem:[#allocation4 + $0xa8] sm:$0xff]  ;;  %v139_v39 = vld [vmem:[#allocation4 + $0xb8] sm:$0xff] }
   0xe   :  { %209 = vmatpush.msrb.mxu0 %v146_v28  ;;  %v142_v34 = vld [vmem:[#allocation4 + $0xd0] sm:$0xff]  ;;  %190 = vmatpush.msra.mxu3 %v141_v33  ;;  %v132_v40 = vld [vmem:[#allocation4 + $0x80] sm:$0xff]  ;;  %v133_v41 = vld [vmem:[#allocation4 + $0x88] sm:$0xff] }
   0xf   :  { %107 = vmatpush.msra.mxu1 %v82_v9  ;;  %v138_v38 = vld [vmem:[#allocation4 + $0xb0] sm:$0xff]  ;;  %171 = vmatpush.msra.mxu2 %v136_v36  ;;  %v135_v43 = vld [vmem:[#allocation4 + $0x98] sm:$0xff]  ;;  %v128_v44 = vld [vmem:[#allocation4 + $0x60] sm:$0xff] }
  0x10   :  { %210 = vmatpush.msrb.mxu0 %v142_v34  ;;  %191 = vmatpush.msra.mxu3 %v137_v37  ;;  %v134_v42 = vld [vmem:[#allocation4 + $0x90] sm:$0xff]  ;;  %v129_v45 = vld [vmem:[#allocation4 + $0x68] sm:$0xff]  ;;  %v131_v47 = vld [vmem:[#allocation4 + $0x78] sm:$0xff] }
  0x11   :  { %108 = vmatpush.msra.mxu1 %v81_v10  ;;  %172 = vmatpush.msra.mxu2 %v132_v40  ;;  %v130_v46 = vld [vmem:[#allocation4 + $0x70] sm:$0xff]  ;;  %v835_v54 = vld [vmem:[%s984_s0 + $0x8] sm:$0xff]  ;;  %s704_s0 = smov 126   ;;  %v124_v1 = vld [vmem:[#allocation4 + $0x40] sm:$0xff] }
  0x12   :  { %211 = vmatpush.msrb.mxu0 %v138_v38  ;;  %192 = vmatpush.msra.mxu3 %v133_v41  ;;  %v125_v2 = vld [vmem:[#allocation4 + $0x48] sm:$0xff]  ;;  %v126_v3 = vld [vmem:[#allocation4 + $0x50] sm:$0xff]  ;;  %v127_v4 = vld [vmem:[#allocation4 + $0x58] sm:$0xff] }
  0x13   :  { %109 = vmatpush.msra.mxu1 %v80_v11  ;;  %v248_v14 = vld.sshfl [vmem:[#allocation1] sm:$0xff pattern:$0x75316420]  ;;  %v249_v15 = vld.sshfl [vmem:[#allocation1 + $0x8] sm:$0xff pattern:$0x75316420]  ;;  %173 = vmatpush.msra.mxu2 %v128_v44 }
  0x14   :  { %254 = vst [vmem:[#allocation1] ss:$2 sm:$0xff] %v798_v13  ;;  %212 = vmatpush.msrb.mxu0 %v134_v42  ;;  %193 = vmatpush.msra.mxu3 %v129_v45  ;;  %v120_v6 = vld [vmem:[#allocation4 + $0x20] sm:$0xff]  ;;  %v121_v7 = vld [vmem:[#allocation4 + $0x28] sm:$0xff]  ;;  %v122_v8 = vld [vmem:[#allocation4 + $0x30] sm:$0xff] }
  0x15   :  { %110 = vmatpush.msra.mxu1 %v79_v12  ;;  %252 = vst [vmem:[#allocation2] sm:$0xf] %v248_v14  ;;  %174 = vmatpush.msra.mxu2 %v124_v1  ;;  %v123_v9 = vld [vmem:[#allocation4 + $0x38] sm:$0xff]  ;;  %v116_v11 = vld [vmem:[#allocation4] sm:$0xff]  ;;  %v117_v12 = vld [vmem:[#allocation4 + $0x8] sm:$0xff] }
  0x16   :  { %253 = vst [vmem:[#allocation2 + $0x8] sm:$0xf] %v249_v15  ;;  %213 = vmatpush.msrb.mxu0 %v130_v46  ;;  %194 = vmatpush.msra.mxu3 %v125_v2  ;;  %v119_v14 = vld [vmem:[#allocation4 + $0x18] sm:$0xff]  ;;  %v667_v28 = vld [vmem:[%s989_s5] ss:$0 sm:$0xff] }
  0x17   :  { %229 = vmatpush.msrb.mxu1 %v147_v29  ;;  %175 = vmatpush.msra.mxu2 %v120_v6 }
  0x18   :  { %214 = vmatpush.msrb.mxu0 %v126_v3  ;;  %195 = vmatpush.msra.mxu3 %v121_v7 }
  0x19   :  { %230 = vmatpush.msrb.mxu1 %v143_v35  ;;  %176 = vmatpush.msra.mxu2 %v116_v11 }
  0x1a   :  { %215 = vmatpush.msrb.mxu0 %v122_v8  ;;  %196 = vmatpush.msra.mxu3 %v117_v12 }
  0x1b   :  { %v802_v16 = vld.sshfl [vmem:[#allocation1] sm:$0xff pattern:$0x75316420]  ;;  %v804_v17 = vld.sshfl [vmem:[#allocation1 + $0x8] sm:$0xff pattern:$0x75316420]  ;;  %231 = vmatpush.msrb.mxu1 %v139_v39 }
  0x1c   :  { %276 = vst [vmem:[#allocation1] ss:$2 sm:$0xff] %v798_v13 }
  0x1d   :  { %232 = vmatpush.msrb.mxu1 %v135_v43 }
  0x1f   :  { %233 = vmatpush.msrb.mxu1 %v131_v47 }
  0x21   :  { %234 = vmatpush.msrb.mxu1 %v127_v4 }
  0x23   :  { %v810_v19 = vld.sshfl [vmem:[#allocation1] sm:$0xff pattern:$0x75316420]  ;;  %v812_v20 = vld.sshfl [vmem:[#allocation1 + $0x8] sm:$0xff pattern:$0x75316420]  ;;  %235 = vmatpush.msrb.mxu1 %v123_v9 }
  0x24   :  { %290 = vst [vmem:[#allocation1] ss:$2 sm:$0xff] %v798_v13  ;;  %v705_v9 = vmov 0.0  }
  0x25   :  { %236 = vmatpush.msrb.mxu1 %v119_v14  ;;  %542 = vst [vmem:[#allocation2 + $0x90] sm:$0xe0] %v705_v9 }
  0x26   :  { %399 = vst [vmem:[#allocation2 + $0x40] sm:$0xe0] %v705_v9 }
  0x27   :  { %400 = vst [vmem:[#allocation2 + $0x48] sm:$0xe0] %v705_v9 }
  0x28   :  { %543 = vst [vmem:[#allocation2 + $0x98] sm:$0xe0] %v705_v9 }
  0x29   :  { %545 = vst.msk [vmem:[#allocation3] sm:$0xff] %vm544_vm10, %v705_v9 }
  0x2b   :  { %v292_v24 = vld.sshfl [vmem:[#allocation1 + $0x8] sm:$0xff pattern:$0x75316420]  ;;  %v291_v25 = vld.sshfl [vmem:[#allocation1] sm:$0xff pattern:$0x75316420] }
  0x2c   :  { %297 = vrot.lane.b32.xlu1 %v292_v24, %s697_s16  ;;  %295 = vrot.lane.b32.xlu0 %v291_v25, %s697_s16  ;;  %310 = vst [vmem:[#allocation1] ss:$2 sm:$0xff] %v798_v13  ;;  %v263_v25 = vlaneseq }
  0x2e   :  { %v867_v29 = vand.u32 127, %v263_v25  ;;  %vm394_vm11 = vcmp.lt.s32.totalorder %v263_v25, 256 }
  0x30   :  { %vm299_vm2 = vcmp.lt.s32.totalorder %v867_v29, 112  ;;  %vm333_vm3 = vcmp.lt.s32.totalorder %v867_v29, 110  ;;  %vm353_vm4 = vcmp.lt.s32.totalorder %v867_v29, 96  ;;  %vm367_vm5 = vcmp.lt.s32.totalorder %v867_v29, 95 }
  0x31   :  { %vm387_vm6 = vcmp.lt.s32.totalorder %v867_v29, 94  ;;  %vm265_vm7 = vcmp.lt.s32.totalorder %v867_v29, 127  ;;  %vm285_vm8 = vcmp.lt.s32.totalorder %v867_v29, 126  ;;  %vm319_vm9 = vcmp.lt.s32.totalorder %v867_v29, 111 }
  0x33   :  { %v311_v30 = vld.sshfl [vmem:[#allocation1] sm:$0xff pattern:$0x75316420]  ;;  %v819_v31 = vld.sshfl [vmem:[#allocation1 + $0x8] sm:$0xff pattern:$0x75316420] }
  0x34   :  { %324 = vst [vmem:[#allocation1] ss:$2 sm:$0xff] %v798_v13  ;;  %315 = vrot.lane.b32.xlu2 %v311_v30, %s698_s3 }
  0x3b   :  { %v326_v48 = vld.sshfl [vmem:[#allocation1 + $0x8] sm:$0xff pattern:$0x75316420]  ;;  %v325_v49 = vld.sshfl [vmem:[#allocation1] sm:$0xff pattern:$0x75316420] }
  0x3c   :  { %331 = vrot.lane.b32.xlu0 %v326_v48, %s699_s6  ;;  %344 = vst [vmem:[#allocation1] ss:$2 sm:$0xff] %v798_v13  ;;  %329 = vrot.lane.b32.xlu2 %v325_v49, %s699_s6 }
  0x43   :  { %v345_v50 = vld.sshfl [vmem:[#allocation1] sm:$0xff pattern:$0x75316420]  ;;  %v346_v51 = vld.sshfl [vmem:[#allocation1 + $0x8] sm:$0xff pattern:$0x75316420] }
  0x44   :  { %349 = vrot.lane.b32.xlu1 %v345_v50, %s700_s17  ;;  %358 = vst [vmem:[#allocation1] ss:$2 sm:$0xff] %v798_v13  ;;  %351 = vrot.lane.b32.xlu2 %v346_v51, %s700_s17 }
  0x4b   :  { %v360_v52 = vld.sshfl [vmem:[#allocation1 + $0x8] sm:$0xff pattern:$0x75316420]  ;;  %v359_v53 = vld.sshfl [vmem:[#allocation1] sm:$0xff pattern:$0x75316420] }
  0x4c   :  { %363 = vrot.lane.b32.xlu1 %v359_v53, %s701_s18  ;;  %378 = vst [vmem:[#allocation1] ss:$2 sm:$0xff] %v798_v13  ;;  %365 = vrot.lane.b32.xlu2 %v360_v52, %s701_s18  ;;  %v118_v13 = vld [vmem:[#allocation4 + $0x10] sm:$0xff] }
  0x4d   :  { %216 = vmatpush.msrb.mxu0 %v118_v13 }
  0x53   :  { %v379_v55 = vld.sshfl [vmem:[#allocation1] sm:$0xff pattern:$0x75316420]  ;;  %v380_v56 = vld.sshfl [vmem:[#allocation1 + $0x8] sm:$0xff pattern:$0x75316420] }
  0x54   :  { %383 = vrot.lane.b32.xlu0 %v379_v55, %s702_s21  ;;  %385 = vrot.lane.b32.xlu1 %v380_v56, %s702_s21  ;;  %404 = vst [vmem:[#allocation1] ss:$2 sm:$0xff] %v835_v54 }
  0x5b   :  { %v405_v57 = vld.sshfl [vmem:[#allocation1] sm:$0xff pattern:$0x75316420]  ;;  %v406_v58 = vld.sshfl [vmem:[#allocation1 + $0x8] sm:$0xff pattern:$0x75316420] }
  0x5c   :  { %409 = vst [vmem:[#allocation2 + $0x50] sm:$0xf] %v405_v57 }
  0x5d   :  { %410 = vst [vmem:[#allocation2 + $0x58] sm:$0xf] %v406_v58 }
  0x5e   :  { %411 = vst [vmem:[#allocation1] ss:$2 sm:$0xff] %v835_v54 }
  0x65   :  { %v412_v59 = vld.sshfl [vmem:[#allocation1] sm:$0xff pattern:$0x75316420]  ;;  %v413_v60 = vld.sshfl [vmem:[#allocation1 + $0x8] sm:$0xff pattern:$0x75316420] }
  0x66   :  { %416 = vrot.lane.b32.xlu0 %v412_v59, %s703_s22  ;;  %418 = vrot.lane.b32.xlu1 %v413_v60, %s703_s22  ;;  %430 = vst [vmem:[#allocation1] ss:$2 sm:$0xff] %v835_v54 }
  0x6d   :  { %v431_v61 = vld.sshfl [vmem:[#allocation1] sm:$0xff pattern:$0x75316420]  ;;  %v432_v62 = vld.sshfl [vmem:[#allocation1 + $0x8] sm:$0xff pattern:$0x75316420] }
  0x6e   :  { %437 = vrot.lane.b32.xlu0 %v432_v62, %s704_s0  ;;  %443 = vst [vmem:[#allocation1] ss:$2 sm:$0xff] %v835_v54  ;;  %435 = vrot.lane.b32.xlu2 %v431_v61, %s704_s0 }
  0x75   :  { %v444_v63 = vld.sshfl [vmem:[#allocation1] sm:$0xff pattern:$0x75316420]  ;;  %v445_v0 = vld.sshfl [vmem:[#allocation1 + $0x8] sm:$0xff pattern:$0x75316420] }
  0x76   :  { %450 = vrot.lane.b32.xlu0 %v445_v0, %s697_s16  ;;  %462 = vst [vmem:[#allocation1] ss:$2 sm:$0xff] %v835_v54  ;;  %448 = vrot.lane.b32.xlu2 %v444_v63, %s697_s16 }
  0x7d   :  { %v463_v5 = vld.sshfl [vmem:[#allocation1] sm:$0xff pattern:$0x75316420]  ;;  %v464_v10 = vld.sshfl [vmem:[#allocation1 + $0x8] sm:$0xff pattern:$0x75316420] }
  0x7e   :  { %475 = vst [vmem:[#allocation1] ss:$2 sm:$0xff] %v835_v54  ;;  %467 = vrot.lane.b32.xlu1 %v463_v5, %s698_s3  ;;  %469 = vrot.lane.b32.xlu2 %v464_v10, %s698_s3 }
  0x85   :  { %v476_v15 = vld.sshfl [vmem:[#allocation1] sm:$0xff pattern:$0x75316420] }
  0x86   :  { %480 = vrot.lane.b32.xlu2 %v476_v15, %s699_s6 }
  0x8a   :  { %v75_v21 = vpop.f32.mrf.mxu0 }
  0x8b   :  { %v76_v22 = vadd.f32 %v666_v18, %v75_v21  ;;  %v477_v18 = vld.sshfl [vmem:[#allocation1 + $0x8] sm:$0xff pattern:$0x75316420] }
  0x8c   :  { %494 = vst [vmem:[#allocation1] ss:$2 sm:$0xff] %v835_v54 }
  0x8d   :  { %v78_v23 = vmax.f32 %v76_v22, 0.0 }
  0x8e   :  { %482 = vrot.lane.b32.xlu2 %v477_v18, %s699_s6  ;;  %v861_v27 = vpop.permute.xlu2 %315 }
  0x8f   :  { %644 = vmatmul.msk.f32.vlgmr.msra.gmra.mxu1 %vm91_vm1, %v78_v23 }
  0x93   :  { %v496_v21 = vld.sshfl [vmem:[#allocation1 + $0x8] sm:$0xff pattern:$0x75316420]  ;;  %v495_v22 = vld.sshfl [vmem:[#allocation1] sm:$0xff pattern:$0x75316420] }
  0x94   :  { %501 = vrot.lane.b32.xlu1 %v496_v21, %s700_s17  ;;  %499 = vrot.lane.b32.xlu0 %v495_v22, %s700_s17  ;;  %507 = vst [vmem:[#allocation1] ss:$2 sm:$0xff] %v835_v54 }
  0x96   :  { %261 = vrot.lane.b32.xlu2 %v804_v17, %s703_s22  ;;  %v330_v17 = vpop.permute.xlu2 %329 }
  0x9b   :  { %v508_v23 = vld.sshfl [vmem:[#allocation1] sm:$0xff pattern:$0x75316420]  ;;  %v509_v24 = vld.sshfl [vmem:[#allocation1 + $0x8] sm:$0xff pattern:$0x75316420] }
  0x9c   :  { %512 = vrot.lane.b32.xlu0 %v508_v23, %s701_s18  ;;  %526 = vst [vmem:[#allocation1] ss:$2 sm:$0xff] %v835_v54 }
  0x9e   :  { %v296_v26 = vpop.permute.xlu0 %295  ;;  %v298_v30 = vpop.permute.xlu1 %297 }
  0x9f   :  { %v300_v33 = vsel %vm299_vm2, %v296_v26, %v298_v30  ;;  %v301_v34 = vsel %vm299_vm2, %v298_v30, %v296_v26  ;;  %v352_v46 = vpop.permute.xlu2 %351 }
  0xa0   :  { %v304_v36 = vrot.slane %v300_v33, 4  ;;  %v305_v37 = vrot.slane %v301_v34, 4 }
  0xa2   :  { %308 = vst [vmem:[#allocation2 + $0x10] sm:$0xf0] %v304_v36 }
  0xa3   :  { %v527_v38 = vld.sshfl [vmem:[#allocation1] sm:$0xff pattern:$0x75316420]  ;;  %309 = vst [vmem:[#allocation2 + $0x18] sm:$0xf0] %v305_v37 }
  0xa4   :  { %531 = vrot.lane.b32.xlu1 %v527_v38, %s702_s21  ;;  %514 = vrot.lane.b32.xlu0 %v509_v24, %s701_s18  ;;  %v528_v43 = vld.sshfl [vmem:[#allocation1 + $0x8] sm:$0xff pattern:$0x75316420]  ;;  %v706_v24 = vmov 1.0  }
  0xa5   :  { %540 = vst.msk [vmem:[#allocation2 + $0x94] ss:$8 sm:$0x3] %vm394_vm11, %v706_v24 }
  0xa6   :  { %397 = vst.msk [vmem:[#allocation2 + $0x44] ss:$8 sm:$0x3] %vm394_vm11, %v706_v24 }
  0xa7   :  { %v366_v50 = vpop.permute.xlu2 %365 }
  0xac   :  { %533 = vrot.lane.b32.xlu1 %v528_v43, %s702_s21  ;;  %317 = vrot.lane.b32.xlu0 %v819_v31, %s698_s3 }
  0xae   :  { %v332_v40 = vpop.permute.xlu0 %331 }
  0xaf   :  { %v334_v41 = vsel %vm333_vm3, %v330_v17, %v332_v40  ;;  %v335_v42 = vsel %vm333_vm3, %v332_v40, %v330_v17 }
  0xb0   :  { %v338_v44 = vrot.slane %v334_v41, 4  ;;  %v339_v45 = vrot.slane %v335_v42, 4 }
  0xb2   :  { %342 = vst [vmem:[#allocation2 + $0x20] sm:$0xf0] %v338_v44 }
  0xb3   :  { %343 = vst [vmem:[#allocation2 + $0x28] sm:$0xf0] %v339_v45 }
  0xb4   :  { %259 = vrot.lane.b32.xlu1 %v802_v16, %s703_s22  ;;  %281 = vrot.lane.b32.xlu0 %v810_v19, %s704_s0 }
  0xb6   :  { %v350_v47 = vpop.permute.xlu1 %349 }
  0xb7   :  { %v354_v48 = vsel %vm353_vm4, %v350_v47, %v352_v46  ;;  %v355_v49 = vsel %vm353_vm4, %v352_v46, %v350_v47 }
  0xb8   :  { %356 = vst [vmem:[#allocation2 + $0x30] sm:$0xf] %v354_v48 }
  0xb9   :  { %357 = vst [vmem:[#allocation2 + $0x38] sm:$0xf] %v355_v49 }
  0xbc   :  { %283 = vrot.lane.b32.xlu1 %v812_v20, %s704_s0 }
  0xbe   :  { %v364_v31 = vpop.permute.xlu1 %363 }
  0xbf   :  { %v368_v51 = vsel %vm367_vm5, %v364_v31, %v366_v50  ;;  %v369_v52 = vsel %vm367_vm5, %v366_v50, %v364_v31 }
  0xc0   :  { %v372_v53 = vrot.slane %v368_v51, 4  ;;  %v373_v54 = vrot.slane %v369_v52, 4 }
  0xc2   :  { %376 = vst [vmem:[#allocation2 + $0x30] sm:$0xf0] %v372_v53 }
  0xc3   :  { %377 = vst [vmem:[#allocation2 + $0x38] sm:$0xf0] %v373_v54 }
  0xc6   :  { %v384_v16 = vpop.permute.xlu0 %383  ;;  %v386_v19 = vpop.permute.xlu1 %385 }
  0xc7   :  { %v388_v55 = vsel %vm387_vm6, %v384_v16, %v386_v19  ;;  %v389_v56 = vsel %vm387_vm6, %v386_v19, %v384_v16 }
  0xc8   :  { %390 = vst [vmem:[#allocation2 + $0x40] sm:$0xf] %v388_v55  ;;  %v436_v63 = vpop.permute.xlu2 %435 }
  0xc9   :  { %391 = vst [vmem:[#allocation2 + $0x48] sm:$0xf] %v389_v56 }
  0xd0   :  { %v449_v4 = vpop.permute.xlu2 %448 }
  0xd8   :  { %v417_v57 = vpop.permute.xlu0 %416  ;;  %v419_v58 = vpop.permute.xlu1 %418 }
  0xd9   :  { %v420_v20 = vsel %vm265_vm7, %v417_v57, %v419_v58  ;;  %v421_v59 = vsel %vm265_vm7, %v419_v58, %v417_v57  ;;  %v470_v14 = vpop.permute.xlu2 %469 }
  0xda   :  { %v424_v60 = vrot.slane %v420_v20, 4  ;;  %v425_v61 = vrot.slane %v421_v59, 4 }
  0xdc   :  { %428 = vst [vmem:[#allocation2 + $0x50] sm:$0xf0] %v424_v60 }
  0xdd   :  { %429 = vst [vmem:[#allocation2 + $0x58] sm:$0xf0] %v425_v61 }
  0xe0   :  { %v438_v62 = vpop.permute.xlu0 %437 }
  0xe1   :  { %v439_v0 = vsel %vm285_vm8, %v436_v63, %v438_v62  ;;  %v440_v1 = vsel %vm285_vm8, %v438_v62, %v436_v63  ;;  %v481_v22 = vpop.permute.xlu2 %480 }
  0xe2   :  { %441 = vst [vmem:[#allocation2 + $0x60] sm:$0xf] %v439_v0 }
  0xe3   :  { %442 = vst [vmem:[#allocation2 + $0x68] sm:$0xf] %v440_v1 }
  0xe8   :  { %v451_v2 = vpop.permute.xlu0 %450 }
  0xe9   :  { %v452_v5 = vsel %vm299_vm2, %v449_v4, %v451_v2  ;;  %v453_v6 = vsel %vm299_vm2, %v451_v2, %v449_v4  ;;  %v483_v34 = vpop.permute.xlu2 %482 }
  0xea   :  { %v456_v7 = vrot.slane %v452_v5, 4  ;;  %v457_v8 = vrot.slane %v453_v6, 4  ;;  %v484_v25 = vsel %vm333_vm3, %v481_v22, %v483_v34  ;;  %v485_v37 = vsel %vm333_vm3, %v483_v34, %v481_v22 }
  0xeb   :  { %v488_v17 = vrot.slane %v484_v25, 4  ;;  %v489_v40 = vrot.slane %v485_v37, 4 }
  0xec   :  { %460 = vst [vmem:[#allocation2 + $0x60] sm:$0xf0] %v456_v7  ;;  %v583_v7 = vld [vmem:[#allocation2 + $0x50] sm:$0xff] }
  0xed   :  { %461 = vst [vmem:[#allocation2 + $0x68] sm:$0xf0] %v457_v8 }
  0xee   :  { %492 = vst [vmem:[#allocation2 + $0x70] sm:$0xf0] %v488_v17 }
  0xef   :  { %493 = vst [vmem:[#allocation2 + $0x78] sm:$0xf0] %v489_v40 }
  0xf0   :  { %v468_v3 = vpop.permute.xlu1 %467 }
  0xf1   :  { %v471_v15 = vsel %vm319_vm9, %v468_v3, %v470_v14  ;;  %v472_v18 = vsel %vm319_vm9, %v470_v14, %v468_v3  ;;  %v262_v52 = vpop.permute.xlu2 %261  ;;  %v580_v14 = vld [vmem:[#allocation2 + $0x38] sm:$0xff] }
  0xf2   :  { %473 = vst [vmem:[#allocation2 + $0x70] sm:$0xf] %v471_v15 }
  0xf3   :  { %474 = vst [vmem:[#allocation2 + $0x78] sm:$0xf] %v472_v18  ;;  %v585_v4 = vld [vmem:[#allocation2 + $0x60] sm:$0xff] }
  0xf4   :  { %v586_v6 = vld [vmem:[#allocation2 + $0x68] sm:$0xff] }
  0xf9   :  { %v587_v63 = vld [vmem:[#allocation2 + $0x70] sm:$0xff] }
  0xfa   :  { %v588_v2 = vld [vmem:[#allocation2 + $0x78] sm:$0xff] }
 0x106   :  { %v502_v10 = vpop.permute.xlu1 %501  ;;  %v500_v11 = vpop.permute.xlu0 %499 }
 0x107   :  { %v503_v12 = vsel %vm353_vm4, %v500_v11, %v502_v10  ;;  %v504_v13 = vsel %vm353_vm4, %v502_v10, %v500_v11  ;;  %v584_v10 = vld [vmem:[#allocation2 + $0x58] sm:$0xff]  ;;  %v581_v11 = vld [vmem:[#allocation2 + $0x40] sm:$0xff] }
 0x108   :  { %505 = vst [vmem:[#allocation2 + $0x80] sm:$0xf] %v503_v12  ;;  %v582_v12 = vld [vmem:[#allocation2 + $0x48] sm:$0xff] }
 0x109   :  { %506 = vst [vmem:[#allocation2 + $0x88] sm:$0xf] %v504_v13  ;;  %v579_v13 = vld [vmem:[#allocation2 + $0x30] sm:$0xff] }
 0x10c   :  { %v112_v32 = vpop.f32.mrf.mxu1 }
 0x10d   :  { %v113_v35 = vadd.f32 %v667_v28, %v112_v32 }
 0x10e   :  { %v513_v21 = vpop.permute.xlu0 %512 }
 0x10f   :  { %v115_v39 = vmax.f32 %v113_v35, 0.0  ;;  %v148_v35 = vld [vmem:[%s991_s7] sm:$0xf]  ;;  %s707_s7 = smov 40  }
 0x110   :  { %v152_v41 = vperm.slane %v148_v35, 2  ;;  %v153_v42 = vperm.slane %v148_v35, 3  ;;  %v150_v31 = vperm.slane %v148_v35, 0  ;;  %v151_v50 = vperm.slane %v148_v35, 1 }
 0x111   :  { %645 = vmatmul.msk.f32.vlgmr.msra.gmra.mxu2 %vm91_vm1, %v115_v39  ;;  %646 = vmatmul.msk.f32.vlgmr.msra.gmra.mxu3 %vm91_vm1, %v115_v39 }
 0x112   :  { %647 = vmatmul.msk.f32.vlgmr.msrb.gmra.mxu0 %vm91_vm1, %v115_v39  ;;  %648 = vmatmul.msk.f32.vlgmr.msrb.gmra.mxu1 %vm91_vm1, %v115_v39 }
 0x116   :  { %v532_v23 = vpop.permute.xlu1 %531  ;;  %v515_v26 = vpop.permute.xlu0 %514 }
 0x117   :  { %v516_v28 = vsel %vm367_vm5, %v513_v21, %v515_v26  ;;  %v517_v30 = vsel %vm367_vm5, %v515_v26, %v513_v21 }
 0x118   :  { %v520_v32 = vrot.slane %v516_v28, 4  ;;  %v521_v33 = vrot.slane %v517_v30, 4 }
 0x11a   :  { %524 = vst [vmem:[#allocation2 + $0x80] sm:$0xf0] %v520_v32 }
 0x11b   :  { %525 = vst [vmem:[#allocation2 + $0x88] sm:$0xf0] %v521_v33 }
 0x11e   :  { %v534_v36 = vpop.permute.xlu1 %533  ;;  %v318_v43 = vpop.permute.xlu0 %317 }
 0x11f   :  { %v535_v38 = vsel %vm387_vm6, %v532_v23, %v534_v36  ;;  %v536_v39 = vsel %vm387_vm6, %v534_v36, %v532_v23  ;;  %v320_v46 = vsel %vm319_vm9, %v861_v27, %v318_v43  ;;  %v321_v47 = vsel %vm319_vm9, %v318_v43, %v861_v27 }
 0x120   :  { %537 = vst [vmem:[#allocation2 + $0x90] sm:$0xf] %v535_v38 }
 0x121   :  { %538 = vst [vmem:[#allocation2 + $0x98] sm:$0xf] %v536_v39  ;;  %v589_v55 = vld [vmem:[#allocation2 + $0x80] sm:$0xff] }
 0x122   :  { %322 = vst [vmem:[#allocation2 + $0x20] sm:$0xf] %v320_v46  ;;  %v590_v60 = vld [vmem:[#allocation2 + $0x88] sm:$0xff] }
 0x123   :  { %323 = vst [vmem:[#allocation2 + $0x28] sm:$0xf] %v321_v47 }
 0x126   :  { %v260_v51 = vpop.permute.xlu1 %259  ;;  %v282_v3 = vpop.permute.xlu0 %281 }
 0x127   :  { %v266_v54 = vsel %vm265_vm7, %v260_v51, %v262_v52  ;;  %v267_v16 = vsel %vm265_vm7, %v262_v52, %v260_v51  ;;  %v591_v27 = vld [vmem:[#allocation2 + $0x90] sm:$0xff] }
 0x128   :  { %v270_v56 = vrot.slane %v266_v54, 4  ;;  %v271_v57 = vrot.slane %v267_v16, 4  ;;  %602 = vmatpush.msrb.mxu2 %v591_v27  ;;  %v592_v59 = vld [vmem:[#allocation2 + $0x98] sm:$0xff] }
 0x129   :  { %622 = vmatpush.msrb.mxu3 %v592_v59  ;;  %v577_v15 = vld [vmem:[#allocation2 + $0x20] sm:$0xff] }
 0x12a   :  { %274 = vst [vmem:[#allocation2] sm:$0xf0] %v270_v56  ;;  %603 = vmatpush.msrb.mxu2 %v589_v55  ;;  %v578_v29 = vld [vmem:[#allocation2 + $0x28] sm:$0xff] }
 0x12b   :  { %275 = vst [vmem:[#allocation2 + $0x8] sm:$0xf0] %v271_v57  ;;  %623 = vmatpush.msrb.mxu3 %v590_v60 }
 0x12c   :  { %604 = vmatpush.msrb.mxu2 %v587_v63 }
 0x12d   :  { %624 = vmatpush.msrb.mxu3 %v588_v2 }
 0x12e   :  { %v284_v5 = vpop.permute.xlu1 %283  ;;  %605 = vmatpush.msrb.mxu2 %v585_v4 }
 0x12f   :  { %v286_v8 = vsel %vm285_vm8, %v282_v3, %v284_v5  ;;  %v287_v9 = vsel %vm285_vm8, %v284_v5, %v282_v3  ;;  %625 = vmatpush.msrb.mxu3 %v586_v6 }
 0x130   :  { %288 = vst [vmem:[#allocation2 + $0x10] sm:$0xf] %v286_v8  ;;  %606 = vmatpush.msrb.mxu2 %v583_v7 }
 0x131   :  { %289 = vst [vmem:[#allocation2 + $0x18] sm:$0xf] %v287_v9  ;;  %626 = vmatpush.msrb.mxu3 %v584_v10  ;;  %v573_v22 = vld [vmem:[#allocation2] sm:$0xff] }
 0x132   :  { %607 = vmatpush.msrb.mxu2 %v581_v11  ;;  %v574_v23 = vld [vmem:[#allocation2 + $0x8] sm:$0xff] }
 0x133   :  { %627 = vmatpush.msrb.mxu3 %v582_v12 }
 0x134   :  { %608 = vmatpush.msrb.mxu2 %v579_v13 }
 0x135   :  { %628 = vmatpush.msrb.mxu3 %v580_v14 }
 0x136   :  { %609 = vmatpush.msrb.mxu2 %v577_v15 }
 0x137   :  { %v575_v18 = vld [vmem:[#allocation2 + $0x10] sm:$0xff]  ;;  %629 = vmatpush.msrb.mxu3 %v578_v29 }
 0x138   :  { %v576_v21 = vld [vmem:[#allocation2 + $0x18] sm:$0xff]  ;;  %610 = vmatpush.msrb.mxu2 %v575_v18 }
 0x139   :  { %630 = vmatpush.msrb.mxu3 %v576_v21 }
 0x13a   :  { %611 = vmatpush.msrb.mxu2 %v573_v22 }
 0x13b   :  { %631 = vmatpush.msrb.mxu3 %v574_v23 }
 0x18f   :  { %v218_v44 = vpop.f32.mrf.mxu0  ;;  %v238_v45 = vpop.f32.mrf.mxu1 }
 0x190   :  { %v219_v48 = vadd.f32 %v218_v44, %v152_v41  ;;  %v957_v49 = vadd.f32 %v238_v45, %v153_v42 }
 0x192   :  { %v243_v53 = vmax.f32 %v219_v48, 0.0  ;;  %v244_v19 = vmax.f32 %v957_v49, 0.0 }
 0x194   :  { %563 = vrot.lane.b32.xlu1 %v243_v53, %s707_s7  ;;  %v178_v58 = vpop.f32.mrf.mxu2  ;;  %v198_v20 = vpop.f32.mrf.mxu3  ;;  %549 = vst.msk [vmem:[#allocation3 + $0x2] sm:$0x1] %vm546_vm12, %v243_v53 }
 0x195   :  { %v179_v61 = vadd.f32 %v178_v58, %v150_v31  ;;  %v199_v62 = vadd.f32 %v198_v20, %v151_v50  ;;  %550 = vst.msk [vmem:[#allocation3 + $0x3] sm:$0x1] %vm546_vm12, %v244_v19 }
 0x197   :  { %v241_v0 = vmax.f32 %v179_v61, 0.0  ;;  %v242_v1 = vmax.f32 %v199_v62, 0.0 }
 0x199   :  { %558 = vrot.lane.b32.xlu0 %v242_v1, %s707_s7  ;;  %552 = vrot.lane.b32.xlu2 %v241_v0, %s707_s7  ;;  %547 = vst.msk [vmem:[#allocation3] sm:$0x1] %vm546_vm12, %v241_v0 }
 0x19a   :  { %548 = vst.msk [vmem:[#allocation3 + $0x1] sm:$0x1] %vm546_vm12, %v242_v1 }
 0x1a1   :  { %568 = vrot.lane.b32.xlu2 %v244_v19, %s707_s7 }
 0x1f3   :  { %v553_v24 = vpop.permute.xlu2 %552 }
 0x1f4   :  { %556 = vst.msk [vmem:[#allocation3 + $0x3] sm:$0x2] %vm555_vm13, %v553_v24 }
 0x1fb   :  { %v569_v26 = vpop.permute.xlu2 %568 }
 0x1fc   :  { %571 = vst.msk [vmem:[#allocation3 + $0x6] sm:$0x2] %vm555_vm13, %v569_v26 }
 0x206   :  { %v564_v28 = vpop.permute.xlu1 %563 }
 0x207   :  { %566 = vst.msk [vmem:[#allocation3 + $0x5] sm:$0x2] %vm555_vm13, %v564_v28 }
 0x20b   :  { %v559_v30 = vpop.permute.xlu0 %558 }
 0x20c   :  { %561 = vst.msk [vmem:[#allocation3 + $0x4] sm:$0x2] %vm555_vm13, %v559_v30 }
 0x213   :  { %v572_v32 = vld [vmem:[#allocation3] sm:$0xff] }
 0x214   :  { %650 = vmatmul.msk.f32.vlgmr.msrb.gmra.mxu2 %vm544_vm10, %v572_v32  ;;  %651 = vmatmul.msk.f32.vlgmr.msrb.gmra.mxu3 %vm544_vm10, %v572_v32 }
 0x297   :  { %v613_v33 = vpop.f32.mrf.mxu2  ;;  %v633_v34 = vpop.f32.mrf.mxu3 }
 0x298   :  { %636 = vst [vmem:[%s992_s8] sm:$0xff] %v613_v33 }
 0x299   :  { %637 = vst [vmem:[%s992_s8 + $0x8] sm:$0xff] %v633_v34 }
 0x29a   :  { %642 = vsyncpa [#allocation5], 1 }

</bundles_post_ra>
